<compile_context>
chip_gen: v5e
topology: v5e:2x2
jax: 0.10.0
libtpu: 0.0.40
codegen_flags: <defaults>
</compile_context>

<pallas_src>
import jax
import jax.numpy as jnp
from jax.experimental import pallas as pl
from jax.experimental.pallas import tpu as pltpu

C = 256
EPS = 1e-5


def _bn_affine_kernel(x_ref, p_ref, o_ref):
    # x_ref: (TN, C) f32;  p_ref: (2, C) f32 = [scale; shift]
    p = p_ref[...]
    scale = p[0:1, :]                       # (1, C), broadcasts over rows
    shift = p[1:2, :]                       # (1, C)
    o_ref[...] = x_ref[...] * scale + shift


def fold_bn_params(gamma, beta, running_mean, running_var, eps=EPS):
    """Fold inference-mode BN into a single affine: y = x*scale + shift."""
    scale = gamma * jax.lax.rsqrt(running_var + eps)
    shift = beta - running_mean * scale
    return scale, shift


def batchnorm1d_pallas(x, scale, shift):
    """x: (N, C) float32; scale/shift: (C,) float32 (pre-folded BN affine)."""
    n, c = x.shape
    assert c == C
    packed = jnp.stack([scale, shift], axis=0)  # (2, C): one input, one DMA

    if n >= 8 and n % 8 == 0:
        # Batched path: 1-D grid over rows, sublane-aligned blocks,
        # parallel so v7x's two TensorCores each take half the row blocks.
        tn = min(n, 512)
        while n % tn != 0:
            tn -= 8
        return pl.pallas_call(
            _bn_affine_kernel,
            out_shape=jax.ShapeDtypeStruct((n, c), jnp.float32),
            grid=(n // tn,),
            in_specs=[pl.BlockSpec((tn, c), lambda i: (i, 0)),
                      pl.BlockSpec((2, c), lambda i: (0, 0))],
            out_specs=pl.BlockSpec((tn, c), lambda i: (i, 0)),
            compiler_params=pltpu.CompilerParams(
                dimension_semantics=("parallel",)),
        )(x, packed)

    # Tiny-batch (N==1) path: single VMEM tile, no grid, no pipelining.
    vmem_spec = pl.BlockSpec(memory_space=pltpu.MemorySpace.VMEM)
    return pl.pallas_call(
        _bn_affine_kernel,
        out_shape=jax.ShapeDtypeStruct((n, c), jnp.float32),
        in_specs=[vmem_spec, vmem_spec],
        out_specs=vmem_spec,
    )(x, packed)


def simplenet_forward(x, params, *, training=False):
    """Reproduces SimpleNet.forward.  x: (N, 256) float32 -> (1, 256, 1, 1)."""
    if training and x.shape[0] == 1:
        # Matches the module's explicit branch: skip BN, just reshape.
        # (PyTorch BN1d itself would raise here; the module sidesteps it.)
        return x.reshape(1, C, 1, 1)
    y = batchnorm1d_pallas(x, params["scale"], params["shift"])
    return y.reshape(1, C, 1, 1)


def init_params():
    # Deterministic, non-trivial parameter init (synthetic; not a checkpoint).
    key = jax.random.PRNGKey(42)
    k1, k2, k3, k4 = jax.random.split(key, 4)
    gamma = 1.0 + 0.1 * jax.random.normal(k1, (C,), dtype=jnp.float32)
    beta = 0.1 * jax.random.normal(k2, (C,), dtype=jnp.float32)
    running_mean = 0.05 * jax.random.normal(k3, (C,), dtype=jnp.float32)
    running_var = 1.0 + 0.1 * jnp.abs(jax.random.normal(k4, (C,), dtype=jnp.float32))
    # Fold once at init time (performance feedback): kernel only sees scale/shift.
    scale, shift = fold_bn_params(gamma, beta, running_mean, running_var)
    return dict(gamma=gamma, beta=beta,
                running_mean=running_mean, running_var=running_var,
                scale=scale, shift=shift)


if __name__ == "__main__":
    params = init_params()

    # --- Module-faithful path: the .view(1, 256, 1, 1) implies batch == 1. ---
    key = jax.random.PRNGKey(0)
    x = jax.random.normal(key, (1, C), dtype=jnp.float32)

    out = simplenet_forward(x, params, training=False)
    out = jax.block_until_ready(out)

    ref = ((x - params["running_mean"]) /
           jnp.sqrt(params["running_var"] + EPS) *
           params["gamma"] + params["beta"]).reshape(1, C, 1, 1)
    assert out.shape == (1, C, 1, 1)
    assert jnp.allclose(out, ref, atol=1e-5, rtol=1e-5)

    # --- Also exercise the batched (gridded) path of the kernel itself. ---
    xb = jax.random.normal(jax.random.PRNGKey(1), (16, C), dtype=jnp.float32)
    yb = jax.block_until_ready(
        batchnorm1d_pallas(xb, params["scale"], params["shift"]))
    ref_b = ((xb - params["running_mean"]) /
             jnp.sqrt(params["running_var"] + EPS) *
             params["gamma"] + params["beta"])
    assert jnp.allclose(yb, ref_b, atol=1e-5, rtol=1e-5)

    print("KERNEL_OK")
</pallas_src>

<mosaic_0001>
module attributes {stable_mosaic.version = 11 : i64} {
  func.func @_bn_affine_kernel(%arg0: memref<1x256xf32, #tpu.memory_space<vmem>>, %arg1: memref<2x256xf32, #tpu.memory_space<vmem>>, %arg2: memref<1x256xf32, #tpu.memory_space<vmem>>) attributes {dimension_semantics = [], scalar_prefetch = 0 : i64, scratch_operands = 0 : i64, tpu.core_type = #tpu.core_type<tc>} {
    %c0 = arith.constant 0 : index
    %c0_0 = arith.constant 0 : index
    %0 = vector.load %arg1[%c0, %c0_0] : memref<2x256xf32, #tpu.memory_space<vmem>>, vector<2x256xf32>
    %1 = vector.extract_strided_slice %0 {offsets = [0, 0], sizes = [1, 256], strides = [1, 1]} : vector<2x256xf32> to vector<1x256xf32>
    %2 = vector.extract_strided_slice %0 {offsets = [1, 0], sizes = [1, 256], strides = [1, 1]} : vector<2x256xf32> to vector<1x256xf32>
    %c0_1 = arith.constant 0 : index
    %c0_2 = arith.constant 0 : index
    %3 = vector.load %arg0[%c0_1, %c0_2] : memref<1x256xf32, #tpu.memory_space<vmem>>, vector<1x256xf32>
    %4 = arith.mulf %3, %1 : vector<1x256xf32>
    %5 = arith.addf %4, %2 : vector<1x256xf32>
    %c0_3 = arith.constant 0 : index
    %c0_4 = arith.constant 0 : index
    %6 = vector.load %arg2[%c0_3, %c0_4] : memref<1x256xf32, #tpu.memory_space<vmem>>, vector<1x256xf32>
    tpu.vector_store %arg2[%c0_3, %c0_4], %5 {strides = array<i32>} : memref<1x256xf32, #tpu.memory_space<vmem>>, vector<1x256xf32>,
    return
  }
}

</mosaic_0001>

<bundles_post_ra>
// kernel: tpu_custom_call.1
= control target key start
LH: loop header
LB: loop body
LE: loop exit
PB: predicated region body
PF: predicated region fallthrough
CT: control target
= control target key end

     0   :  { %7 = vsyncpa [#allocation3], 0  ;;  %s190_s0 = inlined_call_operand.hbm [shape: f32[1,256], index: 0, kind: input, shape index: {}]   ;;  %s191_s1 = inlined_call_operand.hbm [shape: f32[2,256], index: 1, kind: input, shape index: {}]   ;;  %s192_s2 = inlined_call_operand.hbm [shape: f32[1,256], index: 2, kind: output, shape index: {}]  }
   0x1   :  { %8 = vsyncpa [#allocation6], 0 }
   0x2   :  { %9 = vsyncpa [#allocation4], 0  ;;  %s15_s11 = sshll.u32 %s190_s0, 4  ;;  %s163_s12 = smov [#allocation2]   ;;  %s16_s11 = int_to_ptr.hbm [resolvable:$true] %s15_s11 }
   0x3   :  { %s17_s13 = sshll.u32 %s163_s12, 4  ;;  %s26_s16 = sshll.u32 %s191_s1, 4  ;;  %s18_s13 = int_to_ptr.vmem [resolvable:$true] %s17_s13  ;;  %s27_s16 = int_to_ptr.hbm [resolvable:$true] %s26_s16 }
   0x4   :  { %20 = dma.hbm_to_vmem [thread:$0]  %s16_s11, 32, %s18_s13, [#allocation3]  }
   0x5   :  { %s164_s17 = smov [#allocation5]  }
   0x6   :  { %s28_s18 = sshll.u32 %s164_s17, 4  ;;  %s29_s18 = int_to_ptr.vmem [resolvable:$true] %s28_s18 }
   0x7   :  { %31 = dma.hbm_to_vmem [thread:$0]  %s27_s16, 64, %s29_s18, [#allocation6]  }
   0x8   :  { %157 = dma.done.wait [#allocation3], 32  }
   0x9   :  { %158 = vsyncadd [#allocation3], 4294967264 }
   0xa   :  { %159 = dma.done.wait [#allocation6], 64  }
   0xb   :  { %160 = vsyncadd [#allocation6], 4294967232  ;;  %v40_v0 = vld [vmem:[#allocation5] sm:$0xf]  ;;  %vm46_vm0 = vcmask 1040384   ;;  %vm48_vm1 = vcmask 1042434   ;;  %v59_v8 = vlaneseq }
   0xc   :  { %v43_v1 = vrot.slane %v40_v0, 1  ;;  %v44_v2 = vrot.slane %v40_v0, 2  ;;  %v45_v3 = vrot.slane %v40_v0, 3  ;;  %54 = vst [vmem:[#allocation1] sm:$0xff] %v40_v0  ;;  %vm50_vm2 = vcmask 1041408   ;;  %s165_s0 = smov [#allocation7]  }
   0xd   :  { %v41_v4 = vld [vmem:[#allocation2] sm:$0x3]  ;;  %s69_s1 = sshll.u32 %s165_s0, 4  ;;  %s71_s21 = sshll.u32 %s192_s2, 4  ;;  %vm61_vm3 = vcmp.lt.s32.totalorder %v59_v8, 256  ;;  %s70_s1 = int_to_ptr.vmem [resolvable:$true] %s69_s1  ;;  %s72_s21 = int_to_ptr.hbm [resolvable:$true] %s71_s21 }
   0xe   :  { %v47_v5 = vsel %vm46_vm0, %v40_v0, %v43_v1  ;;  %v49_v6 = vsel %vm48_vm1, %v44_v2, %v45_v3 }
   0xf   :  { %v51_v7 = vsel %vm50_vm2, %v47_v5, %v49_v6 }
  0x10   :  { %v53_v9 = vmul.f32 %v51_v7, %v41_v4 }
  0x13   :  { %v56_v10 = vld [vmem:[#allocation1 + $0x1] ss:$2 sm:$0xff] }
  0x14   :  { %v58_v11 = vadd.f32 %v56_v10, %v53_v9 }
  0x16   :  { %63 = vst.msk [vmem:[#allocation7] sm:$0x3] %vm61_vm3, %v58_v11 }
  0x17   :  { %74 = dma.vmem_to_hbm [thread:$0]  %s70_s1, 32, %s72_s21, [#allocation4]  }
  0x18   :  { %161 = dma.done.wait [#allocation4], 32  }
  0x19   :  { %162 = vsyncadd [#allocation4], 4294967264 }
  0x1a   :  { %79 = vsyncpa [#allocation3], 1 }
  0x1b   :  { %80 = vsyncpa [#allocation6], 1 }
  0x1c   :  { %81 = vsyncpa [#allocation4], 1 }

</bundles_post_ra>
